<compile_context>
chip_gen: v7x
topology: tpu7x:2x2x1
jax: 0.10.0
libtpu: 0.0.40
codegen_flags: <defaults>
</compile_context>

<pallas_src>
import math
from functools import partial

import numpy as np
import jax
import jax.numpy as jnp
from jax import lax
from jax.experimental import pallas as pl
from jax.experimental.pallas import tpu as pltpu

_UNROLL_MAX_G = 16               # fully unroll the odd/even network up to this G
_CHUNK_ELEMS = 8 * 1024          # ~8 f32 vregs per live value inside the kernel
_BLOCK_BYTES = 2 * 1024 * 1024   # ~2 MiB HBM block per grid step


def _bitonic_sort_groups(x, group_size):
    """Ascending bitonic sort of every aligned group of G lanes (G = power of 2)."""
    c = x.shape[-1]
    lane = lax.broadcasted_iota(jnp.int32, x.shape, 1)
    k = 2
    while k <= group_size:                      # unrolled at trace time
        j = k // 2
        while j >= 1:
            nxt = pltpu.roll(x, shift=c - j, axis=1)   # value at lane l+j
            prv = pltpu.roll(x, shift=j, axis=1)       # value at lane l-j
            bit_j = lane & j
            is_lower = bit_j == 0                      # lower index of its pair
            partner = jnp.where(is_lower, nxt, prv)
            lo = jnp.minimum(x, partner)
            hi = jnp.maximum(x, partner)
            if k == group_size:
                take_lo = is_lower                     # final merge: ascending
            else:
                # lower index keeps min in ascending regions ((lane & k) == 0).
                take_lo = (bit_j * (k // j)) == (lane & k)
            x = jnp.where(take_lo, lo, hi)
            j //= 2
        k *= 2
    return x


def _odd_even_sort_groups(x, m, group_size):
    """Odd/even transposition sort of every group of G lanes (any G >= 2)."""
    c = x.shape[-1]
    mpar = m & 1                           # hoisted across all passes
    not_last = m < (group_size - 1)
    not_first = m > 0
    even_g = (group_size % 2) == 0

    def one_pass(v, parity):
        nxt = pltpu.roll(v, shift=c - 1, axis=1)
        prv = pltpu.roll(v, shift=1, axis=1)
        lo = jnp.minimum(v, nxt)
        hi = jnp.maximum(v, prv)
        if parity == 0 and even_g:
            # every lane participates: even local index takes lo, odd takes hi
            return jnp.where(mpar == 0, lo, hi)
        is_lo = (mpar == parity) & not_last
        is_hi = (mpar != parity) & not_first
        return jnp.where(is_lo, lo, jnp.where(is_hi, hi, v))

    if group_size <= _UNROLL_MAX_G:
        for p in range(group_size):
            x = one_pass(x, p % 2)
        return x

    def body(_, v):
        return one_pass(one_pass(v, 0), 1)

    # 2*ceil(G/2) >= G passes; extra passes on sorted data are no-ops.
    return lax.fori_loop(0, (group_size + 1) // 2, body, x)


def _groupsort_kernel(*refs, group_size, coef, chunk_rows):
    if len(refs) == 3:
        m_ref, x_ref, o_ref = refs           # non-power-of-two G path
    else:
        m_ref = None
        x_ref, o_ref = refs                  # power-of-two G path

    block_rows, _ = x_ref.shape
    in_dt = x_ref.dtype
    compute_dt = (jnp.float32
                  if (jnp.issubdtype(in_dt, jnp.floating)
                      and jnp.dtype(in_dt).itemsize < 4)
                  else in_dt)

    def process(x):
        xc = x.astype(compute_dt)
        if m_ref is None:
            y = _bitonic_sort_groups(xc, group_size)
        else:
            m = jnp.broadcast_to(m_ref[pl.ds(0, 1), :], xc.shape)
            y = _odd_even_sort_groups(xc, m, group_size)
        if coef != 1.0:
            y = y * coef
        return y.astype(o_ref.dtype)

    nchunks = block_rows // chunk_rows
    if nchunks <= 1:
        o_ref[...] = process(x_ref[...])
    else:
        def chunk_body(ci, carry):
            r0 = pl.multiple_of(ci * chunk_rows, 8)
            o_ref[pl.ds(r0, chunk_rows), :] = process(
                x_ref[pl.ds(r0, chunk_rows), :])
            return carry

        lax.fori_loop(0, nchunks, chunk_body, 0)


def _choose_tiling(rtot, c, itemsize):
    """Pick (block_rows, chunk_rows): chunk | block, multiples of 8 (or == rtot)."""
    if rtot < 8:
        return rtot, rtot
    chunk = max(8, (_CHUNK_ELEMS // c) // 8 * 8)
    chunk = min(chunk, (rtot // 8) * 8)
    target_rows = max(chunk, ((_BLOCK_BYTES // itemsize) // c) // chunk * chunk)
    block_rows = min(target_rows, (rtot // chunk) * chunk)
    if block_rows >= rtot and rtot > chunk:
        # keep >= 2 grid steps so both v7x TensorCores get work
        half = -(-((rtot + 1) // 2) // chunk) * chunk
        block_rows = max(chunk, min(block_rows, half))
    return block_rows, chunk


def group_sort(x, group_size=None, k_coef_lip=1.0):
    """GroupSort forward: view as (-1, G), sort each group ascending, scale."""
    orig_shape = x.shape
    if group_size is None:
        if x.ndim < 2:
            raise ValueError("group_size=None (fullSort) needs input rank >= 2")
        group_size = orig_shape[1]
    group_size = int(group_size)
    total = x.size
    if total == 0:
        return x
    if total % group_size != 0:
        raise ValueError("group_size must divide the number of elements")
    if group_size <= 1:
        return x if k_coef_lip == 1.0 else x * jnp.asarray(k_coef_lip, x.dtype)

    # Lane-dense layout: C = lcm(128, G) so groups are contiguous along lanes
    # and never cross a row boundary.  Padding (whole groups only) is
    # materialized only when C does not divide numel.
    c = 128 * group_size // math.gcd(128, group_size)
    flat = x.reshape(-1)
    total_pad = -(-total // c) * c
    if total_pad != total:
        flat = jnp.pad(flat, (0, total_pad - total))
    rtot = total_pad // c
    arr = flat.reshape(rtot, c)

    itemsize = jnp.dtype(x.dtype).itemsize
    block_rows, chunk_rows = _choose_tiling(rtot, c, itemsize)

    x_spec = pl.BlockSpec((block_rows, c), lambda i: (i, 0))
    pow2 = (group_size & (group_size - 1)) == 0
    if pow2:
        in_specs = [x_spec]
        operands = (arr,)
    else:
        # Within-group lane index, precomputed on host (avoids vector int
        # div/rem inside the kernel).  Tiny and resident across the grid.
        m_row = np.tile(np.arange(group_size, dtype=np.int32), c // group_size)
        m_arr = jnp.asarray(np.ascontiguousarray(
            np.broadcast_to(m_row[None, :], (8, c))))
        in_specs = [pl.BlockSpec((8, c), lambda i: (0, 0)), x_spec]
        operands = (m_arr, arr)

    kernel = partial(_groupsort_kernel, group_size=group_size,
                     coef=float(k_coef_lip), chunk_rows=chunk_rows)
    out = pl.pallas_call(
        kernel,
        out_shape=jax.ShapeDtypeStruct((rtot, c), x.dtype),
        grid=(pl.cdiv(rtot, block_rows),),
        in_specs=in_specs,
        out_specs=pl.BlockSpec((block_rows, c), lambda i: (i, 0)),
        compiler_params=pltpu.CompilerParams(
            dimension_semantics=("parallel",)),
    )(*operands)

    if total_pad != total:
        return out.reshape(-1)[:total].reshape(orig_shape)
    return out.reshape(orig_shape)


class GroupSortPallas:
    """Mirror of torchlip.GroupSort(group_size, k_coef_lip). No parameters."""

    def __init__(self, group_size=None, k_coef_lip=1.0):
        self.group_size = group_size
        self._coefficient_lip = k_coef_lip

    def __call__(self, x):
        return group_sort(x, self.group_size, self._coefficient_lip)


if __name__ == "__main__":
    key = jax.random.PRNGKey(0)
    keys = jax.random.split(key, 7)

    def ref_group_sort(x, g, coef):
        xs = jnp.sort(x.astype(jnp.float32).reshape(-1, g), axis=-1)
        return (xs * coef).astype(x.dtype).reshape(x.shape)

    # 1) GroupSort2 on a conv-style activation (bitonic, mem-bound path).
    x1 = jax.random.normal(keys[0], (2, 4, 16, 16), dtype=jnp.float32)
    y1 = GroupSortPallas(group_size=2)(x1)
    jax.block_until_ready(y1)
    assert y1.shape == x1.shape and y1.dtype == x1.dtype
    assert jnp.allclose(y1, ref_group_sort(x1, 2, 1.0), atol=1e-6, rtol=1e-6)

    # 2) fullSort (group_size=None -> G = 32): bitonic network + pad path.
    x2 = jax.random.normal(keys[1], (2, 32), dtype=jnp.float32)
    y2 = GroupSortPallas(group_size=None)(x2)
    jax.block_until_ready(y2)
    assert y2.shape == x2.shape
    assert jnp.allclose(y2, ref_group_sort(x2, 32, 1.0), atol=1e-6, rtol=1e-6)

    # 3) bf16 input + GroupSort4 + non-unit Lipschitz coefficient.
    x3 = jax.random.normal(keys[2], (4, 8, 8), dtype=jnp.bfloat16)
    y3 = GroupSortPallas(group_size=4, k_coef_lip=0.5)(x3)
    jax.block_until_ready(y3)
    assert y3.shape == x3.shape and y3.dtype == jnp.bfloat16
    assert jnp.allclose(y3.astype(jnp.float32),
                        ref_group_sort(x3, 4, 0.5).astype(jnp.float32),
                        atol=1e-2, rtol=1e-2)

    # 4) non-power-of-two even G=6 (odd/even network, unrolled, m operand).
    x4 = jax.random.normal(keys[3], (2, 6, 8), dtype=jnp.float32)
    y4 = GroupSortPallas(group_size=6)(x4)
    jax.block_until_ready(y4)
    assert jnp.allclose(y4, ref_group_sort(x4, 6, 1.0), atol=1e-6, rtol=1e-6)

    # 5) non-power-of-two odd G=5 (boundary-masked odd/even passes).
    x5 = jax.random.normal(keys[4], (3, 5, 4), dtype=jnp.float32)
    y5 = GroupSortPallas(group_size=5)(x5)
    jax.block_until_ready(y5)
    assert jnp.allclose(y5, ref_group_sort(x5, 5, 1.0), atol=1e-6, rtol=1e-6)

    # 6) non-power-of-two large G=20 (fullSort, fori_loop odd/even path).
    x6 = jax.random.normal(keys[5], (4, 20), dtype=jnp.float32)
    y6 = GroupSortPallas(group_size=None)(x6)
    jax.block_until_ready(y6)
    assert jnp.allclose(y6, ref_group_sort(x6, 20, 1.0), atol=1e-6, rtol=1e-6)

    # 7) multi-block grid, inner chunk loop and a partial last block (G=2).
    x7 = jax.random.normal(keys[6], (17, 32, 64), dtype=jnp.float32)
    y7 = GroupSortPallas(group_size=2)(x7)
    jax.block_until_ready(y7)
    assert jnp.allclose(y7, ref_group_sort(x7, 2, 1.0), atol=1e-6, rtol=1e-6)

    print("KERNEL_OK")
</pallas_src>

<mosaic_0001>
module attributes {stable_mosaic.version = 11 : i64} {
  func.func @_groupsort_kernel(%arg0: i32, %arg1: memref<16x128xf32, #tpu.memory_space<vmem>>, %arg2: memref<16x128xf32, #tpu.memory_space<vmem>>) attributes {dimension_semantics = [#tpu.dimension_semantics<parallel>], iteration_bounds = array<i64: 1>, scalar_prefetch = 0 : i64, scratch_operands = 0 : i64, tpu.core_type = #tpu.core_type<tc>, window_params = [{transform_indices = @transform_0, window_bounds = array<i64: 16, 128>}, {transform_indices = @transform_1, window_bounds = array<i64: 16, 128>}]} {
    %c0 = arith.constant 0 : index
    %c0_0 = arith.constant 0 : index
    %0 = vector.load %arg1[%c0, %c0_0] : memref<16x128xf32, #tpu.memory_space<vmem>>, vector<16x128xf32>
    %1 = tpu.iota {dimensions = array<i32: 1>} : vector<16x128xi32>
    %c127_i32 = arith.constant 127 : i32
    %2 = tpu.dynamic_rotate %0 by %c127_i32 dim 1 : vector<16x128xf32>, i32 -> vector<16x128xf32>
    %c1_i32 = arith.constant 1 : i32
    %3 = tpu.dynamic_rotate %0 by %c1_i32 dim 1 : vector<16x128xf32>, i32 -> vector<16x128xf32>
    %c1_i32_1 = arith.constant 1 : i32
    %4 = vector.broadcast %c1_i32_1 : i32 to vector<16x128xi32>
    %5 = arith.andi %1, %4 : vector<16x128xi32>
    %c0_i32 = arith.constant 0 : i32
    %6 = vector.broadcast %c0_i32 : i32 to vector<16x128xi32>
    %7 = arith.cmpi eq, %5, %6 : vector<16x128xi32>
    %8 = arith.select %7, %2, %3 : vector<16x128xi1>, vector<16x128xf32>
    %9 = arith.minimumf %0, %8 : vector<16x128xf32>
    %10 = arith.maximumf %0, %8 : vector<16x128xf32>
    %11 = arith.select %7, %9, %10 : vector<16x128xi1>, vector<16x128xf32>
    %c0_2 = arith.constant 0 : index
    %c0_3 = arith.constant 0 : index
    %12 = vector.load %arg2[%c0_2, %c0_3] : memref<16x128xf32, #tpu.memory_space<vmem>>, vector<16x128xf32>
    tpu.vector_store %arg2[%c0_2, %c0_3], %11 {strides = array<i32>} : memref<16x128xf32, #tpu.memory_space<vmem>>, vector<16x128xf32>,
    return
  }
  func.func @transform_0(%arg0: i32) -> (i32, i32) {
    %c0_i32 = arith.constant 0 : i32
    %c0_i32_0 = arith.constant 0 : i32
    return %arg0, %c0_i32 : i32, i32
  }
  func.func @transform_1(%arg0: i32) -> (i32, i32) {
    %c0_i32 = arith.constant 0 : i32
    %c0_i32_0 = arith.constant 0 : i32
    return %arg0, %c0_i32 : i32, i32
  }
}

</mosaic_0001>

<bundles_post_ra>
// kernel: tpu_custom_call.1
= control target key start
LH: loop header
LB: loop body
LE: loop exit
PB: predicated region body
PF: predicated region fallthrough
CT: control target
= control target key end

     0   :  { %6 = vsyncpa [#allocation3], 0  ;;  %s176_s0 = inlined_call_operand.hbm [shape: f32[16,128], index: 0, kind: input, shape index: {}]   ;;  %s177_s1 = inlined_call_operand.hbm [shape: f32[16,128], index: 1, kind: output, shape index: {}]  }
   0x1   :  { %7 = vsyncpa [#allocation4], 0  ;;  %s118_s6 = smov [#allocation2]   ;;  %s70_s10 = scalar_lea.hbm %s176_s0, 256 }
   0x2   :  { %s13_s7 = sshll.u32 %s118_s6, 4  ;;  %p71_p0 = scmp.ne.s32.totalorder %s176_s0, %s70_s10  ;;  %s14_s7 = int_to_ptr.vmem [resolvable:$true] %s13_s7 }
   0x3   :  { %p74_p1 = scmp.lt.u32.totalorder %s70_s10, %s176_s0 }
   0x5   :  { %p76_p2 = pnand %p74_p1, %p71_p0 }
   0x7   :  { %79 = shalt.err (!%p76_p2)
}
   0x8   :  { %s80_s15 = scalar_lea.vmem %s14_s7, 256  ;;  %p85_p4 = scmp.lt.s32.totalorder %s14_s7, %s14_s7 }
   0x9   :  { %p81_p3 = scmp.ne.s32.totalorder %s14_s7, %s80_s15  ;;  %p86_p5 = scmp.lt.s32.totalorder %s80_s15, %s80_s15 }
   0xb   :  { %p87_p6 = por %p86_p5, %p85_p4 }
   0xd   :  { %p88_p7 = pnand %p87_p6, %p81_p3 }
   0xf   :  { %91 = shalt.err (!%p88_p7)
}
  0x10   :  { %s119_s16 = smov 128   ;;  %s120_s17 = smov 8  }
  0x11   :  { %19 = dma.hbm_to_vmem [thread:$0]  %s176_s0, 256, %s14_s7, [#allocation3], %s119_s16, %s119_s16, %s120_s17  }
  0x12   :  { %114 = dma.done.wait [#allocation3], 256  }
  0x13   :  { %115 = vsyncadd [#allocation3], 4294967040  ;;  %v23_v0 = vld [vmem:[#allocation2] sm:$0xff]  ;;  %s121_s20 = smov 1   ;;  %s122_s21 = smov 127   ;;  %v24_v1 = vld [vmem:[#allocation2 + $0x8] sm:$0xff]  ;;  %v25_v2 = vlaneseq }
  0x14   :  { %31 = vrot.lane.b32.xlu1 %v23_v0, %s121_s20  ;;  %27 = vrot.lane.b32.xlu0 %v23_v0, %s122_s21  ;;  %s123_s0 = smov [#allocation5]  }
  0x15   :  { %v26_v3 = vand.u32 127, %v25_v2  ;;  %s52_s22 = sshll.u32 %s123_s0, 4  ;;  %s53_s22 = int_to_ptr.vmem [resolvable:$true] %s52_s22 }
  0x16   :  { %s92_s23 = scalar_lea.vmem %s53_s22, 256  ;;  %p97_p9 = scmp.lt.s32.totalorder %s53_s22, %s53_s22 }
  0x17   :  { %v35_v4 = vand.u32 1, %v26_v3  ;;  %p93_p8 = scmp.ne.s32.totalorder %s53_s22, %s92_s23  ;;  %p98_p10 = scmp.lt.s32.totalorder %s92_s23, %s92_s23 }
  0x18   :  { %33 = vrot.lane.b32.xlu1 %v24_v1, %s121_s20  ;;  %29 = vrot.lane.b32.xlu0 %v24_v1, %s122_s21 }
  0x19   :  { %vm149_vm0 = vcmp.eq.s32.totalorder %v35_v4, 0  ;;  %p99_p11 = por %p98_p10, %p97_p9 }
  0x1b   :  { %p100_p12 = pnand %p99_p11, %p93_p8 }
  0x86   :  { %v32_v6 = vpop.permute.xlu1 %31  ;;  %v28_v7 = vpop.permute.xlu0 %27 }
  0x87   :  { %v37_v8 = vsel %vm149_vm0, %v28_v7, %v32_v6 }
  0x88   :  { %v39_v9 = vmin.f32 %v23_v0, %v37_v8  ;;  %v41_v10 = vmax.f32 %v23_v0, %v37_v8 }
  0x8a   :  { %v34_v11 = vpop.permute.xlu1 %33  ;;  %v30_v12 = vpop.permute.xlu0 %29  ;;  %v43_v13 = vsel %vm149_vm0, %v39_v9, %v41_v10 }
  0x8b   :  { %v38_v14 = vsel %vm149_vm0, %v30_v12, %v34_v11  ;;  %45 = vst [vmem:[#allocation5] sm:$0xff] %v43_v13 }
  0x8c   :  { %v40_v15 = vmin.f32 %v24_v1, %v38_v14  ;;  %v42_v16 = vmax.f32 %v24_v1, %v38_v14 }
  0x8e   :  { %v44_v17 = vsel %vm149_vm0, %v40_v15, %v42_v16 }
  0x8f   :  { %46 = vst [vmem:[#allocation5 + $0x8] sm:$0xff] %v44_v17 }
  0x90   :  { %103 = shalt.err (!%p100_p12)
}
  0x91   :  { %s104_s26 = scalar_lea.hbm %s177_s1, 256 }
  0x92   :  { %p105_p13 = scmp.ne.s32.totalorder %s177_s1, %s104_s26  ;;  %p108_p0 = scmp.lt.u32.totalorder %s104_s26, %s177_s1 }
  0x94   :  { %p110_p1 = pnand %p108_p0, %p105_p13 }
  0x96   :  { %113 = shalt.err (!%p110_p1)
}
  0x97   :  { %58 = dma.vmem_to_hbm [thread:$0]  %s53_s22, 256, %s177_s1, [#allocation4], %s119_s16, %s119_s16, %s120_s17  }
  0x98   :  { %116 = dma.done.wait [#allocation4], 256  }
  0x99   :  { %117 = vsyncadd [#allocation4], 4294967040 }
  0x9a   :  { %62 = vsyncpa [#allocation3], 1 }
  0x9b   :  { %63 = vsyncpa [#allocation4], 1 }

</bundles_post_ra>
